<compile_context>
chip_gen: v7x
topology: tpu7x:2x2x1
jax: 0.10.0
libtpu: 0.0.40
codegen_flags: <defaults>
</compile_context>

<pallas_src>
import functools
import math

import numpy as np
import jax
import jax.numpy as jnp
from jax.experimental import pallas as pl
from jax.experimental.pallas import tpu as pltpu

_LANE = 128
_SUBLANE = 16                              # row-tile granularity (f32 refs + bf16 values)
_VMEM_DATA_BUDGET = 16 * 1024 * 1024       # clamp target for the per-call estimate
_VMEM_LIMIT_BYTES = 32 * 1024 * 1024       # explicit scoped-VMEM limit (<= physical everywhere)


# ----------------------------- kernel ---------------------------------------


def timepara_kernel(x_ref, w1_ref, b1_ref, w2_ref, b2_ref, wh_ref, bh_ref,
                    out_ref):
    # x arrives as f32 (no extra HBM cast pass in the wrapper); cast to bf16 here.
    x = x_ref[...].astype(w1_ref.dtype)
    # linear1 + relu   (bf16 operands, f32 MXU accumulation)
    h = jnp.dot(x, w1_ref[...], preferred_element_type=jnp.float32) + b1_ref[...]
    h = jnp.maximum(h, 0.0).astype(w2_ref.dtype)
    # linear2 + relu
    h = jnp.dot(h, w2_ref[...], preferred_element_type=jnp.float32) + b2_ref[...]
    h = jnp.maximum(h, 0.0).astype(wh_ref.dtype)
    # fused head: [linear_weight | linear_bias] in one MXU dot
    y = jnp.dot(h, wh_ref[...], preferred_element_type=jnp.float32) + bh_ref[...]
    out_ref[...] = (y * y + 1e-05).astype(out_ref.dtype)


# ----------------------------- sizing helpers --------------------------------


def _round_up(a, m):
    return (a + m - 1) // m * m


def _group_factor(out2, input_dim, hidden_dim):
    """Smallest g such that g*out2 is a multiple of 128 lanes (lane-dense output).
    Declines (returns 1) if the block-diagonal weights would get large: they are
    VMEM-resident for the whole kernel and kron(I_g, W) inflates MXU flops by g
    (a v5e concern)."""
    if out2 % _LANE == 0:
        return 1
    g = _LANE // math.gcd(out2, _LANE)
    wbytes = 2 * (g * input_dim * g * hidden_dim
                  + (g * hidden_dim) ** 2
                  + g * hidden_dim * g * out2)
    if g > 16 or wbytes > (2 << 20):
        return 1
    return g


def _block_diag(w, g, dtype):
    """kron(I_g, w): g copies of w on the block diagonal (exact zeros elsewhere)."""
    if g == 1:
        return w.astype(dtype)
    return jnp.kron(jnp.eye(g, dtype=jnp.float32), w).astype(dtype)


def _padded_2d_bytes(rows, cols, itemsize):
    return _round_up(rows, 8) * _round_up(cols, _LANE) * itemsize


def _vmem_estimate(rt_g, gin, ghid, gout, out_itemsize):
    x_tile = 2 * _padded_2d_bytes(rt_g, gin, 4)                 # f32, double-buffered
    o_tile = 2 * _padded_2d_bytes(rt_g, gout, out_itemsize)     # double-buffered
    wts = 2 * (_padded_2d_bytes(gin, ghid, 2)                   # bf16 weights (x2 buffers)
               + _padded_2d_bytes(ghid, ghid, 2)
               + _padded_2d_bytes(ghid, gout, 2)
               + 2 * _padded_2d_bytes(1, ghid, 4)
               + _padded_2d_bytes(1, gout, 4))
    interm = 2 * _padded_2d_bytes(rt_g, ghid, 4) + _padded_2d_bytes(rt_g, gout, 4)
    return x_tile + o_tile + wts + interm


def _choose_rt_g(n_g, row_tile, g, gin, ghid, gout, out_itemsize):
    """Grouped-row tile: as big as possible (amortize per-step overhead), but keep
    >= 2 grid steps when there is enough work (v7x megacore) and stay within the
    VMEM budget."""
    if n_g <= _SUBLANE:
        return n_g                                   # single full block (always legal)
    rt = max(_SUBLANE, (max(row_tile, 1) // g) // _SUBLANE * _SUBLANE)
    rt = min(rt, _round_up(pl.cdiv(n_g, 2), _SUBLANE))
    while rt > _SUBLANE and _vmem_estimate(rt, gin, ghid, gout,
                                           out_itemsize) > _VMEM_DATA_BUDGET:
        rt -= _SUBLANE
    return rt


# ----------------------------- wrapper ---------------------------------------


@functools.partial(
    jax.jit,
    static_argnames=("fnum", "num_marks", "row_tile", "compute_dtype", "out_dtype"))
def timepara_forward(x, params, fnum, num_marks, *, row_tile=4096,
                     compute_dtype=jnp.bfloat16, out_dtype=jnp.float32):
    """x: (B, S, input_dim) float32.  Returns (weight, bias), each of shape
    (B, S, num_marks, fnum), matching the PyTorch module (eval mode)."""
    B, S, input_dim = x.shape
    N = B * S
    out_dim = fnum * num_marks
    out2 = 2 * out_dim

    w1, b1, w2, b2, ww, bw, wb, bb = params
    hidden_dim = w1.shape[1]
    assert ww.shape[1] == out_dim

    # ---- row-group packing factor (lane-dense output) ------------------------
    g = _group_factor(out2, input_dim, hidden_dim)
    # g == 1 fallback: zero-pad the fused-head columns up to 128 lanes instead
    # (lane-dense stores without block-diag inflation of layers 1-2).
    out2_pad = out2 if g > 1 else _round_up(out2, _LANE)

    # ---- input: free row-major reshape; NO cast / pad pass in the common case
    x2d = x.reshape(N, input_dim)
    n_pad = _round_up(N, g)
    if n_pad != N:
        # Rare fallback (N % g != 0): costs one extra HBM pass over x.
        x2d = jnp.pad(x2d, ((0, n_pad - N), (0, 0)))
    n_g = n_pad // g
    x_g = x2d.reshape(n_g, g * input_dim)          # metadata-only reshape

    # ---- weights: fuse the two heads, build block-diagonal grouped weights ---
    whead = jnp.concatenate([ww, wb], axis=1)      # (hidden, 2*out_dim)
    bhead = jnp.concatenate([bw, bb], axis=1)      # (1, 2*out_dim)
    if out2_pad != out2:
        whead = jnp.pad(whead, ((0, 0), (0, out2_pad - out2)))
        bhead = jnp.pad(bhead, ((0, 0), (0, out2_pad - out2)))
    w1_g = _block_diag(w1, g, compute_dtype)       # (g*in,  g*hid)
    w2_g = _block_diag(w2, g, compute_dtype)       # (g*hid, g*hid)
    wh_g = _block_diag(whead, g, compute_dtype)    # (g*hid, g*out2_pad)
    b1_g = jnp.tile(b1.astype(jnp.float32), (1, g))
    b2_g = jnp.tile(b2.astype(jnp.float32), (1, g))
    bh_g = jnp.tile(bhead.astype(jnp.float32), (1, g))

    gin, ghid, gout = g * input_dim, g * hidden_dim, g * out2_pad

    # ---- tiling ----------------------------------------------------------------
    out_itemsize = np.dtype(out_dtype).itemsize
    rt_g = _choose_rt_g(n_g, row_tile, g, gin, ghid, gout, out_itemsize)
    grid = (pl.cdiv(n_g, rt_g),)                   # partial last block handled by Pallas

    x_spec = pl.BlockSpec((rt_g, gin), lambda i: (i, 0))
    full = lambda shape: pl.BlockSpec(shape, lambda i: (0,) * len(shape))
    out_spec = pl.BlockSpec((rt_g, gout), lambda i: (i, 0))

    packed = pl.pallas_call(
        timepara_kernel,
        grid=grid,
        in_specs=[
            x_spec,
            full((gin, ghid)), full((1, ghid)),
            full((ghid, ghid)), full((1, ghid)),
            full((ghid, gout)), full((1, gout)),
        ],
        out_specs=out_spec,
        out_shape=jax.ShapeDtypeStruct((n_g, gout), out_dtype),
        compiler_params=pltpu.CompilerParams(
            dimension_semantics=("parallel",),
            vmem_limit_bytes=_VMEM_LIMIT_BYTES),
    )(x_g, w1_g, b1_g, w2_g, b2_g, wh_g, bh_g)

    flat = packed.reshape(n_pad, out2_pad)         # free row-major reshape
    weight = flat[:N, :out_dim].reshape(B, S, num_marks, fnum)
    bias = flat[:N, out_dim:out2].reshape(B, S, num_marks, fnum)
    return weight, bias


# ----------------------------- params & reference ----------------------------


def init_params(key, input_dim, hidden_dim, fnum, num_marks):
    """Deterministic parameter init. Linear weights stored as (in, out),
    biases as (1, out) for a TPU-friendly 2D layout."""
    out_dim = fnum * num_marks
    ks = jax.random.split(key, 8)

    def lin(kw, kb, fan_in, fan_out):
        bound = 1.0 / jnp.sqrt(fan_in)
        w = jax.random.uniform(kw, (fan_in, fan_out), jnp.float32, -bound, bound)
        b = jax.random.uniform(kb, (1, fan_out), jnp.float32, -bound, bound)
        return w, b

    w1, b1 = lin(ks[0], ks[1], input_dim, hidden_dim)
    w2, b2 = lin(ks[2], ks[3], hidden_dim, hidden_dim)
    ww, bw = lin(ks[4], ks[5], hidden_dim, out_dim)
    wb, bb = lin(ks[6], ks[7], hidden_dim, out_dim)
    return (w1, b1, w2, b2, ww, bw, wb, bb)


def timepara_ref(x, params, fnum, num_marks, compute_dtype=jnp.bfloat16):
    """Pure-JAX reference of the PyTorch forward (eval mode), mirroring the
    kernel's bf16-in / f32-accumulate matmul dtype policy."""
    w1, b1, w2, b2, ww, bw, wb, bb = params
    B, S, D = x.shape

    def mm(a, w):
        return jnp.dot(a.astype(compute_dtype), w.astype(compute_dtype),
                       preferred_element_type=jnp.float32)

    h = jax.nn.relu(mm(x.reshape(-1, D), w1) + b1)
    h = jax.nn.relu(mm(h, w2) + b2)
    wgt = mm(h, ww) + bw
    bia = mm(h, wb) + bb
    wgt = wgt * wgt + 1e-05
    bia = bia * bia + 1e-05
    return (wgt.reshape(B, S, num_marks, fnum),
            bia.reshape(B, S, num_marks, fnum))


# ----------------------------- demo / test -----------------------------------


if __name__ == "__main__":
    input_dim, hidden_dim, fnum, num_marks = 32, 32, 4, 2

    key = jax.random.PRNGKey(0)
    kx1, kx2, kx3, kp = jax.random.split(key, 4)
    params = init_params(kp, input_dim, hidden_dim, fnum, num_marks)

    def check(x):
        wgt, bia = timepara_forward(x, params, fnum, num_marks)
        jax.block_until_ready((wgt, bia))
        wref, bref = timepara_ref(x, params, fnum, num_marks)
        B, S, _ = x.shape
        assert wgt.shape == (B, S, num_marks, fnum)
        assert bia.shape == (B, S, num_marks, fnum)
        assert jnp.allclose(wgt, wref, rtol=5e-3, atol=1e-4)
        assert jnp.allclose(bia, bref, rtol=5e-3, atol=1e-4)

    # 1) Rows divide the tile: multi-step grid (megacore-splittable on v7x),
    #    grouped lane-dense path, no padding and no wrapper-side cast pass.
    check(jax.random.normal(kx1, (4, 256, input_dim), jnp.float32))

    # 2) Rows do not divide the tile: partial last block (masked boundary
    #    stores), still no padding pass over x.
    check(jax.random.normal(kx2, (4, 50, input_dim), jnp.float32))

    # 3) Rows not a multiple of the group factor g: rare zero-pad fallback path,
    #    single tiny full block.
    check(jax.random.normal(kx3, (2, 9, input_dim), jnp.float32))

    print("KERNEL_OK")
</pallas_src>

<mosaic_0001>
module attributes {stable_mosaic.version = 11 : i64} {
  func.func @timepara_kernel(%arg0: i32, %arg1: memref<64x256xf32, #tpu.memory_space<vmem>>, %arg2: memref<256x256xbf16, #tpu.memory_space<vmem>>, %arg3: memref<1x256xf32, #tpu.memory_space<vmem>>, %arg4: memref<256x256xbf16, #tpu.memory_space<vmem>>, %arg5: memref<1x256xf32, #tpu.memory_space<vmem>>, %arg6: memref<256x128xbf16, #tpu.memory_space<vmem>>, %arg7: memref<1x128xf32, #tpu.memory_space<vmem>>, %arg8: memref<64x128xf32, #tpu.memory_space<vmem>>) attributes {dimension_semantics = [#tpu.dimension_semantics<parallel>], iteration_bounds = array<i64: 2>, scalar_prefetch = 0 : i64, scratch_operands = 0 : i64, tpu.core_type = #tpu.core_type<tc>, window_params = [{transform_indices = @transform_0, window_bounds = array<i64: 64, 256>}, {pipeline_mode = #tpu.pipeline_mode<synchronous>, transform_indices = @transform_1, window_bounds = array<i64: 256, 256>}, {pipeline_mode = #tpu.pipeline_mode<synchronous>, transform_indices = @transform_2, window_bounds = array<i64: 1, 256>}, {pipeline_mode = #tpu.pipeline_mode<synchronous>, transform_indices = @transform_3, window_bounds = array<i64: 256, 256>}, {pipeline_mode = #tpu.pipeline_mode<synchronous>, transform_indices = @transform_4, window_bounds = array<i64: 1, 256>}, {pipeline_mode = #tpu.pipeline_mode<synchronous>, transform_indices = @transform_5, window_bounds = array<i64: 256, 128>}, {pipeline_mode = #tpu.pipeline_mode<synchronous>, transform_indices = @transform_6, window_bounds = array<i64: 1, 128>}, {transform_indices = @transform_7, window_bounds = array<i64: 64, 128>}]} {
    %c0 = arith.constant 0 : index
    %c0_0 = arith.constant 0 : index
    %0 = vector.load %arg1[%c0, %c0_0] : memref<64x256xf32, #tpu.memory_space<vmem>>, vector<64x256xf32>
    %1 = arith.truncf %0 : vector<64x256xf32> to vector<64x256xbf16>
    %c0_1 = arith.constant 0 : index
    %c0_2 = arith.constant 0 : index
    %2 = vector.load %arg2[%c0_1, %c0_2] : memref<256x256xbf16, #tpu.memory_space<vmem>>, vector<256x256xbf16>
    %cst = arith.constant dense<0.000000e+00> : vector<64x256xf32>
    %3 = tpu.matmul %1, %2, %cst {dimension_numbers = #tpu.dot_dimension_numbers<[1], [0], [0], [1], [0, 0, 1, 1], [], []>} : vector<64x256xbf16>, vector<256x256xbf16>, vector<64x256xf32> -> vector<64x256xf32>
    %c0_3 = arith.constant 0 : index
    %c0_4 = arith.constant 0 : index
    %4 = vector.load %arg3[%c0_3, %c0_4] : memref<1x256xf32, #tpu.memory_space<vmem>>, vector<1x256xf32>
    %5 = vector.broadcast %4 : vector<1x256xf32> to vector<64x256xf32>
    %6 = arith.addf %3, %5 : vector<64x256xf32>
    %cst_5 = arith.constant 0.000000e+00 : f32
    %7 = vector.broadcast %cst_5 : f32 to vector<64x256xf32>
    %8 = arith.maximumf %6, %7 : vector<64x256xf32>
    %9 = arith.truncf %8 : vector<64x256xf32> to vector<64x256xbf16>
    %c0_6 = arith.constant 0 : index
    %c0_7 = arith.constant 0 : index
    %10 = vector.load %arg4[%c0_6, %c0_7] : memref<256x256xbf16, #tpu.memory_space<vmem>>, vector<256x256xbf16>
    %cst_8 = arith.constant dense<0.000000e+00> : vector<64x256xf32>
    %11 = tpu.matmul %9, %10, %cst_8 {dimension_numbers = #tpu.dot_dimension_numbers<[1], [0], [0], [1], [0, 0, 1, 1], [], []>} : vector<64x256xbf16>, vector<256x256xbf16>, vector<64x256xf32> -> vector<64x256xf32>
    %c0_9 = arith.constant 0 : index
    %c0_10 = arith.constant 0 : index
    %12 = vector.load %arg5[%c0_9, %c0_10] : memref<1x256xf32, #tpu.memory_space<vmem>>, vector<1x256xf32>
    %13 = vector.broadcast %12 : vector<1x256xf32> to vector<64x256xf32>
    %14 = arith.addf %11, %13 : vector<64x256xf32>
    %cst_11 = arith.constant 0.000000e+00 : f32
    %15 = vector.broadcast %cst_11 : f32 to vector<64x256xf32>
    %16 = arith.maximumf %14, %15 : vector<64x256xf32>
    %17 = arith.truncf %16 : vector<64x256xf32> to vector<64x256xbf16>
    %c0_12 = arith.constant 0 : index
    %c0_13 = arith.constant 0 : index
    %18 = vector.load %arg6[%c0_12, %c0_13] : memref<256x128xbf16, #tpu.memory_space<vmem>>, vector<256x128xbf16>
    %cst_14 = arith.constant dense<0.000000e+00> : vector<64x128xf32>
    %19 = tpu.matmul %17, %18, %cst_14 {dimension_numbers = #tpu.dot_dimension_numbers<[1], [0], [0], [1], [0, 0, 1, 1], [], []>} : vector<64x256xbf16>, vector<256x128xbf16>, vector<64x128xf32> -> vector<64x128xf32>
    %c0_15 = arith.constant 0 : index
    %c0_16 = arith.constant 0 : index
    %20 = vector.load %arg7[%c0_15, %c0_16] : memref<1x128xf32, #tpu.memory_space<vmem>>, vector<1x128xf32>
    %21 = vector.broadcast %20 : vector<1x128xf32> to vector<64x128xf32>
    %22 = arith.addf %19, %21 : vector<64x128xf32>
    %23 = arith.mulf %22, %22 : vector<64x128xf32>
    %cst_17 = arith.constant 9.99999974E-6 : f32
    %24 = vector.broadcast %cst_17 : f32 to vector<64x128xf32>
    %25 = arith.addf %23, %24 : vector<64x128xf32>
    %c0_18 = arith.constant 0 : index
    %c0_19 = arith.constant 0 : index
    %26 = vector.load %arg8[%c0_18, %c0_19] : memref<64x128xf32, #tpu.memory_space<vmem>>, vector<64x128xf32>
    tpu.vector_store %arg8[%c0_18, %c0_19], %25 {strides = array<i32>} : memref<64x128xf32, #tpu.memory_space<vmem>>, vector<64x128xf32>,
    return
  }
  func.func @transform_0(%arg0: i32) -> (i32, i32) {
    %c0_i32 = arith.constant 0 : i32
    %c0_i32_0 = arith.constant 0 : i32
    return %arg0, %c0_i32 : i32, i32
  }
  func.func @transform_1(%arg0: i32) -> (i32, i32) {
    %c0_i32 = arith.constant 0 : i32
    %c0_i32_0 = arith.constant 0 : i32
    %c0_i32_1 = arith.constant 0 : i32
    return %c0_i32, %c0_i32_0 : i32, i32
  }
  func.func @transform_2(%arg0: i32) -> (i32, i32) {
    %c0_i32 = arith.constant 0 : i32
    %c0_i32_0 = arith.constant 0 : i32
    %c0_i32_1 = arith.constant 0 : i32
    return %c0_i32, %c0_i32_0 : i32, i32
  }
  func.func @transform_3(%arg0: i32) -> (i32, i32) {
    %c0_i32 = arith.constant 0 : i32
    %c0_i32_0 = arith.constant 0 : i32
    %c0_i32_1 = arith.constant 0 : i32
    return %c0_i32, %c0_i32_0 : i32, i32
  }
  func.func @transform_4(%arg0: i32) -> (i32, i32) {
    %c0_i32 = arith.constant 0 : i32
    %c0_i32_0 = arith.constant 0 : i32
    %c0_i32_1 = arith.constant 0 : i32
    return %c0_i32, %c0_i32_0 : i32, i32
  }
  func.func @transform_5(%arg0: i32) -> (i32, i32) {
    %c0_i32 = arith.constant 0 : i32
    %c0_i32_0 = arith.constant 0 : i32
    %c0_i32_1 = arith.constant 0 : i32
    return %c0_i32, %c0_i32_0 : i32, i32
  }
  func.func @transform_6(%arg0: i32) -> (i32, i32) {
    %c0_i32 = arith.constant 0 : i32
    %c0_i32_0 = arith.constant 0 : i32
    %c0_i32_1 = arith.constant 0 : i32
    return %c0_i32, %c0_i32_0 : i32, i32
  }
  func.func @transform_7(%arg0: i32) -> (i32, i32) {
    %c0_i32 = arith.constant 0 : i32
    %c0_i32_0 = arith.constant 0 : i32
    return %arg0, %c0_i32 : i32, i32
  }
}

</mosaic_0001>

<bundles_post_ra>
// kernel: timepara_forward.1
= control target key start
LH: loop header
LB: loop body
LE: loop exit
PB: predicated region body
PF: predicated region fallthrough
CT: control target
= control target key end

     0   :  { %s1510_s24 = smov 0   ;;  %s1854_s0 = inlined_call_operand.vmem [shape: f32[128,256], index: 0, kind: input, shape index: {}]   ;;  %s1855_s1 = inlined_call_operand.vmem [shape: bf16[256,256], index: 1, kind: input, shape index: {}]   ;;  %s1856_s2 = inlined_call_operand.vmem [shape: f32[1,256], index: 2, kind: input, shape index: {}]   ;;  %s1857_s3 = inlined_call_operand.vmem [shape: bf16[256,256], index: 3, kind: input, shape index: {}]   ;;  %s1858_s4 = inlined_call_operand.vmem [shape: f32[1,256], index: 4, kind: input, shape index: {}]   ;;  %s1859_s5 = inlined_call_operand.vmem [shape: bf16[256,128], index: 5, kind: input, shape index: {}]   ;;  %s1860_s6 = inlined_call_operand.vmem [shape: f32[1,128], index: 6, kind: input, shape index: {}]   ;;  %s1861_s7 = inlined_call_operand.vmem [shape: f32[128,128], index: 7, kind: output, shape index: {}]  }
   0x1 LB: > { %s1192_s25 = sadd.s32 4294967295, %s1468_s24   ;;  %p1196_p0 = scmp.ge.s32.totalorder %s1468_s24, 1  ;;  %s1468_s24 = sphi %s1510_s24, %s17_s24  }
   0x2   : > { %p239_p1 = scmp.lt.s32.totalorder %s1468_s24, 3 }
   0x4   : > { %p240_p2 = pnand %p1196_p0, %p239_p1 }
   0x5   : > { %v1350_v0 = vld [vmem:[%s1855_s1 + $0x4] ss:$8 sps:$4 sm:$0xff] (!%p240_p2)   ;;  %v1352_v1 = vld [vmem:[%s1855_s1] ss:$8 sps:$4 sm:$0xff] (!%p240_p2)   ;;  %v1353_v2 = vld [vmem:[%s1855_s1 + $0x14] ss:$8 sps:$4 sm:$0xff] (!%p240_p2)  }
   0x6   : > { %243 = sbr.rel (%p240_p2) target bundleno = 762 (0x2fa), region = 48  ;;  %514 = vmatprep.subr.bf16.mxu0 (!%p240_p2), %v1350_v0  ;;  %v1355_v3 = vld [vmem:[%s1855_s1 + $0x10] ss:$8 sps:$4 sm:$0xff] (!%p240_p2)   ;;  %v1356_v4 = vld [vmem:[%s1855_s1 + $0x24] ss:$8 sps:$4 sm:$0xff] (!%p240_p2)   ;;  %s1197_s13 = sshll.u32 (!%p240_p2), %s1192_s25, 3 }
   0x7   : > { %515 = vmatpush1.bf16.msra.mxu0 (!%p240_p2), %v1352_v1  ;;  %v1358_v5 = vld [vmem:[%s1855_s1 + $0x20] ss:$8 sps:$4 sm:$0xff] (!%p240_p2)   ;;  %p273_p3 = scmp.lt.s32.totalorder (!%p240_p2), %s1197_s13, 15  ;;  %v1359_v6 = vld [vmem:[%s1855_s1 + $0x34] ss:$8 sps:$4 sm:$0xff] (!%p240_p2)  }
   0x8   : > { %516 = vmatprep.subr.bf16.mxu0 (!%p240_p2), %v1353_v2  ;;  %v1361_v7 = vld [vmem:[%s1855_s1 + $0x30] ss:$8 sps:$4 sm:$0xff] (!%p240_p2)   ;;  %v1362_v8 = vld [vmem:[%s1855_s1 + $0x44] ss:$8 sps:$4 sm:$0xff] (!%p240_p2)   ;;  %v1364_v9 = vld [vmem:[%s1855_s1 + $0x40] ss:$8 sps:$4 sm:$0xff] (!%p240_p2)  }
   0x9   : > { %v1365_v10 = vld [vmem:[%s1855_s1 + $0x54] ss:$8 sps:$4 sm:$0xff] (!%p240_p2)   ;;  %v1367_v11 = vld [vmem:[%s1855_s1 + $0x50] ss:$8 sps:$4 sm:$0xff] (!%p240_p2)   ;;  %v1368_v12 = vld [vmem:[%s1855_s1 + $0x64] ss:$8 sps:$4 sm:$0xff] (!%p240_p2)  }
   0xa   : > { %v1370_v16 = vld [vmem:[%s1855_s1 + $0x60] ss:$8 sps:$4 sm:$0xff] (!%p240_p2)   ;;  %v1371_v17 = vld [vmem:[%s1855_s1 + $0x74] ss:$8 sps:$4 sm:$0xff] (!%p240_p2)   ;;  %v1373_v18 = vld [vmem:[%s1855_s1 + $0x70] ss:$8 sps:$4 sm:$0xff] (!%p240_p2)  }
   0xb   : > { %517 = vmatpush1.bf16.msra.mxu0 (!%p240_p2), %v1355_v3  ;;  %v1374_v19 = vld [vmem:[%s1855_s1 + $0x84] ss:$8 sps:$4 sm:$0xff] (!%p240_p2)   ;;  %v1400_v21 = vld [vmem:[%s1857_s3] ss:$8 sps:$4 sm:$0xff] (!%p240_p2)   ;;  %v1401_v22 = vld [vmem:[%s1857_s3 + $0x14] ss:$8 sps:$4 sm:$0xff] (!%p240_p2)  }
   0xc   : > { %518 = vmatprep.subr.bf16.mxu0 (!%p240_p2), %v1356_v4  ;;  %v1398_v20 = vld [vmem:[%s1857_s3 + $0x4] ss:$8 sps:$4 sm:$0xff] (!%p240_p2)   ;;  %v1403_v23 = vld [vmem:[%s1857_s3 + $0x10] ss:$8 sps:$4 sm:$0xff] (!%p240_p2)   ;;  %v1376_v24 = vld [vmem:[%s1855_s1 + $0x80] ss:$8 sps:$4 sm:$0xff] (!%p240_p2)  }
   0xd   : > { %s1863_s13 = smov (!%p273_p3, %s1197_s13), 15  ;;  %815 = vmatprep.subr.bf16.mxu1 %v1398_v20  ;;  %v1404_v25 = vld [vmem:[%s1857_s3 + $0x24] ss:$8 sps:$4 sm:$0xff]   ;;  %v1377_v26 = vld [vmem:[%s1855_s1 + $0x94] ss:$8 sps:$4 sm:$0xff]  }
   0xe   : > { %s1285_s25 = sshll.u32 %s1863_s13, 4  ;;  %816 = vmatpush1.bf16.msra.mxu1 %v1400_v21  ;;  %v1406_v27 = vld [vmem:[%s1857_s3 + $0x20] ss:$8 sps:$4 sm:$0xff]   ;;  %v1379_v28 = vld [vmem:[%s1855_s1 + $0x90] ss:$8 sps:$4 sm:$0xff]   ;;  %s1201_s10 = sshll.u32 %s1863_s13, 3 }
   0xf   : > { %519 = vmatpush1.bf16.msra.mxu0 %v1358_v5  ;;  %s1557_s30 = scalar_lea.vmem %s1854_s0, %s1285_s25  ;;  %817 = vmatprep.subr.bf16.mxu1 %v1401_v22  ;;  %v1407_v29 = vld [vmem:[%s1857_s3 + $0x34] ss:$8 sps:$4 sm:$0xff]   ;;  %v1380_v30 = vld [vmem:[%s1855_s1 + $0xa4] ss:$8 sps:$4 sm:$0xff]   ;;  %v1409_v31 = vld [vmem:[%s1857_s3 + $0x30] ss:$8 sps:$4 sm:$0xff]   ;;  %s1841_s12 = scalar_lea.vmem %s1861_s7, %s1201_s10 }
  0x10   : > { %520 = vmatprep.subr.bf16.mxu0 %v1359_v6  ;;  %v287_v13 = vld [vmem:[%s1557_s30 + $0x8] sm:$0xff]  ;;  %v289_v14 = vld [vmem:[%s1557_s30 + $0x18] sm:$0xff]  ;;  %v286_v53 = vld [vmem:[%s1557_s30] sm:$0xff] }
  0x11   : > { %v303_v15 = vpack.c.bf16 %v289_v14, %v287_v13  ;;  %v1382_v32 = vld [vmem:[%s1855_s1 + $0xa0] ss:$8 sps:$4 sm:$0xff]   ;;  %v1410_v33 = vld [vmem:[%s1857_s3 + $0x44] ss:$8 sps:$4 sm:$0xff]   ;;  %v1383_v34 = vld [vmem:[%s1855_s1 + $0xb4] ss:$8 sps:$4 sm:$0xff]  }
  0x12   : > { %818 = vmatpush1.bf16.msra.mxu1 %v1403_v23  ;;  %v1385_v35 = vld [vmem:[%s1855_s1 + $0xb0] ss:$8 sps:$4 sm:$0xff]   ;;  %v1412_v36 = vld [vmem:[%s1857_s3 + $0x40] ss:$8 sps:$4 sm:$0xff]   ;;  %v1386_v37 = vld [vmem:[%s1855_s1 + $0xc4] ss:$8 sps:$4 sm:$0xff]  }
  0x13   : > { %521 = vmatpush1.bf16.msra.mxu0 %v1361_v7  ;;  %546 = vmatprep.mubr.bf16.mxu0 %v303_v15  ;;  %v1413_v38 = vld [vmem:[%s1857_s3 + $0x54] ss:$8 sps:$4 sm:$0xff]   ;;  %v1415_v39 = vld [vmem:[%s1857_s3 + $0x50] ss:$8 sps:$4 sm:$0xff]   ;;  %v1388_v40 = vld [vmem:[%s1855_s1 + $0xc0] ss:$8 sps:$4 sm:$0xff]  }
  0x14   : > { %522 = vmatprep.subr.bf16.mxu0 %v1362_v8  ;;  %819 = vmatprep.subr.bf16.mxu1 %v1404_v25  ;;  %v1416_v41 = vld [vmem:[%s1857_s3 + $0x64] ss:$8 sps:$4 sm:$0xff]   ;;  %v1389_v42 = vld [vmem:[%s1855_s1 + $0xd4] ss:$8 sps:$4 sm:$0xff]   ;;  %v1418_v43 = vld [vmem:[%s1857_s3 + $0x60] ss:$8 sps:$4 sm:$0xff]  }
  0x15   : > { %v1391_v44 = vld [vmem:[%s1855_s1 + $0xd0] ss:$8 sps:$4 sm:$0xff]   ;;  %v1419_v45 = vld [vmem:[%s1857_s3 + $0x74] ss:$8 sps:$4 sm:$0xff]   ;;  %v1392_v46 = vld [vmem:[%s1855_s1 + $0xe4] ss:$8 sps:$4 sm:$0xff]  }
  0x16   : > { %820 = vmatpush1.bf16.msra.mxu1 %v1406_v27  ;;  %v1421_v47 = vld [vmem:[%s1857_s3 + $0x70] ss:$8 sps:$4 sm:$0xff]   ;;  %v1394_v48 = vld [vmem:[%s1855_s1 + $0xe0] ss:$8 sps:$4 sm:$0xff]   ;;  %v1422_v49 = vld [vmem:[%s1857_s3 + $0x84] ss:$8 sps:$4 sm:$0xff]  }
  0x17   : > { %523 = vmatpush1.bf16.msra.mxu0 %v1364_v9  ;;  %821 = vmatprep.subr.bf16.mxu1 %v1407_v29  ;;  %v1395_v50 = vld [vmem:[%s1855_s1 + $0xf4] ss:$8 sps:$4 sm:$0xff]   ;;  %v1397_v51 = vld [vmem:[%s1855_s1 + $0xf0] ss:$8 sps:$4 sm:$0xff]   ;;  %v1424_v52 = vld [vmem:[%s1857_s3 + $0x80] ss:$8 sps:$4 sm:$0xff]  }
  0x18   : > { %524 = vmatprep.subr.bf16.mxu0 %v1365_v10  ;;  %v288_v54 = vld [vmem:[%s1557_s30 + $0x10] sm:$0xff]  ;;  %v291_v56 = vld [vmem:[%s1557_s30 + $0x28] sm:$0xff]  ;;  %v293_v57 = vld [vmem:[%s1557_s30 + $0x38] sm:$0xff] }
  0x19   : > { %v1425_v55 = vld [vmem:[%s1857_s3 + $0x94] ss:$8 sps:$4 sm:$0xff]   ;;  %v302_v58 = vpack.c.bf16 %v288_v54, %v286_v53  ;;  %v1427_v59 = vld [vmem:[%s1857_s3 + $0x90] ss:$8 sps:$4 sm:$0xff]   ;;  %v305_v60 = vpack.c.bf16 %v293_v57, %v291_v56  ;;  %v1428_v61 = vld [vmem:[%s1857_s3 + $0xa4] ss:$8 sps:$4 sm:$0xff]  }
  0x1a   : > { %822 = vmatpush1.bf16.msra.mxu1 %v1409_v31  ;;  %v1430_v62 = vld [vmem:[%s1857_s3 + $0xa0] ss:$8 sps:$4 sm:$0xff]   ;;  %v292_v0 = vld [vmem:[%s1557_s30 + $0x30] sm:$0xff]  ;;  %v297_v3 = vld [vmem:[%s1557_s30 + $0x58] sm:$0xff] }
  0x1b   : > { %525 = vmatpush1.bf16.msra.mxu0 %v1367_v11  ;;  %823 = vmatprep.subr.bf16.mxu1 %v1410_v33  ;;  %v290_v63 = vld [vmem:[%s1557_s30 + $0x20] sm:$0xff]  ;;  %v1431_v1 = vld [vmem:[%s1857_s3 + $0xb4] ss:$8 sps:$4 sm:$0xff]   ;;  %v295_v2 = vld [vmem:[%s1557_s30 + $0x48] sm:$0xff] }
  0x1c   : > { %526 = vmatprep.subr.bf16.mxu0 %v1368_v12  ;;  %v304_v4 = vpack.c.bf16 %v292_v0, %v290_v63  ;;  %v1433_v5 = vld [vmem:[%s1857_s3 + $0xb0] ss:$8 sps:$4 sm:$0xff]   ;;  %v307_v6 = vpack.c.bf16 %v297_v3, %v295_v2  ;;  %v1434_v7 = vld [vmem:[%s1857_s3 + $0xc4] ss:$8 sps:$4 sm:$0xff]   ;;  %v1436_v8 = vld [vmem:[%s1857_s3 + $0xc0] ss:$8 sps:$4 sm:$0xff]  }
  0x1d   : > { %v294_v9 = vld [vmem:[%s1557_s30 + $0x40] sm:$0xff]  ;;  %v296_v10 = vld [vmem:[%s1557_s30 + $0x50] sm:$0xff]  ;;  %v299_v12 = vld [vmem:[%s1557_s30 + $0x68] sm:$0xff] }
  0x1e   : > { %824 = vmatpush1.bf16.msra.mxu1 %v1412_v36  ;;  %v1437_v11 = vld [vmem:[%s1857_s3 + $0xd4] ss:$8 sps:$4 sm:$0xff]   ;;  %v306_v14 = vpack.c.bf16 %v296_v10, %v294_v9  ;;  %v1440_v20 = vld [vmem:[%s1857_s3 + $0xe4] ss:$8 sps:$4 sm:$0xff]   ;;  %v1442_v21 = vld [vmem:[%s1857_s3 + $0xe0] ss:$8 sps:$4 sm:$0xff]  }
  0x1f   : > { %527 = vmatpush1.bf16.msra.mxu0 %v1370_v16  ;;  %825 = vmatprep.subr.bf16.mxu1 %v1413_v38  ;;  %v301_v13 = vld [vmem:[%s1557_s30 + $0x78] sm:$0xff]  ;;  %v298_v16 = vld [vmem:[%s1557_s30 + $0x60] sm:$0xff]  ;;  %v1449_v27 = vld [vmem:[%s1859_s5 + $0x8] sm:$0xff]  }
  0x20   : > { %528 = vmatprep.subr.bf16.mxu0 %v1371_v17  ;;  %v309_v15 = vpack.c.bf16 %v301_v13, %v299_v12  ;;  %v300_v17 = vld [vmem:[%s1557_s30 + $0x70] sm:$0xff]  ;;  %v1447_v25 = vld [vmem:[%s1859_s5] sm:$0xff]   ;;  %v1763_v31 = vld [vmem:[%s1859_s5 + $0x18] sm:$0xff]  }
  0x21   : > { %v1443_v22 = vld [vmem:[%s1857_s3 + $0xf4] ss:$8 sps:$4 sm:$0xff]   ;;  %v1445_v23 = vld [vmem:[%s1857_s3 + $0xf0] ss:$8 sps:$4 sm:$0xff]   ;;  %v1775_v33 = vld [vmem:[%s1859_s5 + $0x20] sm:$0xff]  }
  0x22   : > { %826 = vmatpush1.bf16.msra.mxu1 %v1415_v39  ;;  %v1752_v29 = vld [vmem:[%s1859_s5 + $0x10] sm:$0xff]   ;;  %v342_v38 = vld [vmem:[%s1856_s2] sm:$0x3] }
  0x23   : > { %529 = vmatpush1.bf16.msra.mxu0 %v1373_v18  ;;  %827 = vmatprep.subr.bf16.mxu1 %v1416_v41  ;;  %v308_v18 = vpack.c.bf16 %v300_v17, %v298_v16 }
  0x24   : > { %530 = vmatprep.subr.bf16.mxu0 %v1374_v19  ;;  %v1439_v19 = vld [vmem:[%s1857_s3 + $0xd0] ss:$8 sps:$4 sm:$0xff]  }
  0x26   : > { %828 = vmatpush1.bf16.msra.mxu1 %v1418_v43 }
  0x27   : > { %531 = vmatpush1.bf16.msra.mxu0 %v1376_v24  ;;  %829 = vmatprep.subr.bf16.mxu1 %v1419_v45  ;;  %v1446_v24 = vld [vmem:[%s1859_s5 + $0x40] sm:$0xff]  }
  0x28   : > { %532 = vmatprep.subr.bf16.mxu0 %v1377_v26  ;;  %v1448_v26 = vld [vmem:[%s1859_s5 + $0x48] sm:$0xff]  }
  0x2a   : > { %830 = vmatpush1.bf16.msra.mxu1 %v1421_v47 }
  0x2b   : > { %533 = vmatpush1.bf16.msra.mxu0 %v1379_v28  ;;  %831 = vmatprep.subr.bf16.mxu1 %v1422_v49  ;;  %v1450_v28 = vld [vmem:[%s1859_s5 + $0x50] sm:$0xff]  }
  0x2c   : > { %534 = vmatprep.subr.bf16.mxu0 %v1380_v30  ;;  %v1757_v30 = vld [vmem:[%s1859_s5 + $0x58] sm:$0xff]  }
  0x2e   : > { %832 = vmatpush1.bf16.msra.mxu1 %v1424_v52 }
  0x2f   : > { %535 = vmatpush1.bf16.msra.mxu0 %v1382_v32  ;;  %833 = vmatprep.subr.bf16.mxu1 %v1425_v55  ;;  %v1769_v32 = vld [vmem:[%s1859_s5 + $0x60] sm:$0xff]  }
  0x30   : > { %536 = vmatprep.subr.bf16.mxu0 %v1383_v34  ;;  %v1781_v34 = vld [vmem:[%s1859_s5 + $0x68] sm:$0xff]  }
  0x32   : > { %834 = vmatpush1.bf16.msra.mxu1 %v1427_v59 }
  0x33   : > { %537 = vmatpush1.bf16.msra.mxu0 %v1385_v35  ;;  %835 = vmatprep.subr.bf16.mxu1 %v1428_v61  ;;  %v344_v35 = vlaneseq }
  0x34   : > { %538 = vmatprep.subr.bf16.mxu0 %v1386_v37 }
  0x35   : > { %v1785_v36 = vshrl.u32 %v344_v35, 7 }
  0x36   : > { %836 = vmatpush1.bf16.msra.mxu1 %v1430_v62 }
  0x37   : > { %539 = vmatpush1.bf16.msra.mxu0 %v1388_v40  ;;  %837 = vmatprep.subr.bf16.mxu1 %v1431_v1  ;;  %v346_v37 = vsub.s32 0, %v1785_v36  ;;  %v350_v39 = vsub.s32 1, %v1785_v36 }
  0x38   : > { %540 = vmatprep.subr.bf16.mxu0 %v1389_v42 }
  0x39   : > { %v347_v40 = vrot.slane %v342_v38, %v346_v37  ;;  %v1796_v41 = vrot.slane %v342_v38, %v350_v39 }
  0x3a   : > { %838 = vmatpush1.bf16.msra.mxu1 %v1433_v5 }
  0x3b   : > { %541 = vmatpush1.bf16.msra.mxu0 %v1391_v44  ;;  %839 = vmatprep.subr.bf16.mxu1 %v1434_v7 }
  0x3c   : > { %542 = vmatprep.subr.bf16.mxu0 %v1392_v46 }
  0x3e   : > { %840 = vmatpush1.bf16.msra.mxu1 %v1436_v8 }
  0x3f   : > { %543 = vmatpush1.bf16.msra.mxu0 %v1394_v48  ;;  %841 = vmatprep.subr.bf16.mxu1 %v1437_v11 }
  0x40   : > { %544 = vmatprep.subr.bf16.mxu0 %v1395_v50 }
  0x42   : > { %842 = vmatpush1.bf16.msra.mxu1 %v1439_v19 }
  0x43   : > { %545 = vmatpush1.bf16.msra.mxu0 %v1397_v51  ;;  %843 = vmatprep.subr.bf16.mxu1 %v1440_v20 }
  0x44   : > { %1286 = vmatprep.subr.bf16.mxu0 %v1446_v24 }
  0x46   : > { %547 = vmatmul.mubr.bf16.vlgmr.msra.gmra.mrb[0].mxu0 %v302_v58  ;;  %844 = vmatpush1.bf16.msra.mxu1 %v1442_v21 }
  0x47   : > { %556 = vmatprep.mubr.bf16.mxu0 %v305_v60  ;;  %845 = vmatprep.subr.bf16.mxu1 %v1443_v22 }
  0x48   : > { %1287 = vmatpush3.bf16.msra.mxu0 %v1447_v25 }
  0x49   : > { %1288 = vmatprep.subr.bf16.mxu0 %v1448_v26 }
  0x4a   : > { %846 = vmatpush1.bf16.msra.mxu1 %v1445_v23 }
  0x4b   : > { %1326 = vmatprep.subr.bf16.mxu1 %v1446_v24 }
  0x4c   : > { %1289 = vmatpush3.bf16.msra.mxu0 %v1449_v27 }
  0x4d   : > { %1290 = vmatprep.subr.bf16.mxu0 %v1450_v28 }
  0x4e   : > { %557 = vmatmul.mubr.bf16.gmra.mrb[4].mxu0 %v304_v4 }
  0x4f   : > { %566 = vmatprep.mubr.bf16.mxu0 %v307_v6 }
  0x50   : > { %1291 = vmatpush3.bf16.msra.mxu0 %v1752_v29 }
  0x51   : > { %1292 = vmatprep.subr.bf16.mxu0 %v1757_v30 }
  0x54   : > { %1293 = vmatpush3.bf16.msra.mxu0 %v1763_v31 }
  0x55   : > { %1294 = vmatprep.subr.bf16.mxu0 %v1769_v32 }
  0x56   : > { %567 = vmatmul.mubr.bf16.gmra.mrb[8].mxu0 %v306_v14 }
  0x57   : > { %576 = vmatprep.mubr.bf16.mxu0 %v309_v15 }
  0x58   : > { %1295 = vmatpush3.bf16.msra.mxu0 %v1775_v33 }
  0x59   : > { %1296 = vmatprep.subr.bf16.mxu0 %v1781_v34 }
  0x5e   : > { %577 = vmatmul.mubr.bf16.gmra.mrb[12].mxu0 %v308_v18 }
 0x119   : > { %v548_v42 = vpop.f32.mrb[0].mxu0 }
 0x11a   : > { %v549_v43 = vadd.f32 %v548_v42, %v347_v40  ;;  %v550_v44 = vpop.f32.mrb[1].mxu0  ;;  %v643_v42 = vld [vmem:[%s1858_s4] sm:$0x3] }
 0x11b   : > { %v551_v45 = vadd.f32 %v550_v44, %v1796_v41  ;;  %v552_v46 = vpop.f32.mrb[2].mxu0  ;;  %v652_v44 = vrot.slane %v643_v42, %v350_v39 }
 0x11c   : > { %v553_v47 = vadd.f32 %v552_v46, %v347_v40  ;;  %v554_v48 = vpop.f32.mrb[3].mxu0  ;;  %v587_v50 = vmax.f32 %v549_v43, 0.0  ;;  %v648_v43 = vrot.slane %v643_v42, %v346_v37 }
 0x11d   : > { %v555_v49 = vadd.f32 %v554_v48, %v1796_v41  ;;  %v588_v52 = vmax.f32 %v551_v45, 0.0 }
 0x11e   : > { %v589_v51 = vmax.f32 %v553_v47, 0.0 }
 0x11f   : > { %v590_v53 = vmax.f32 %v555_v49, 0.0 }
 0x120   : > { %v603_v54 = vpack.c.bf16 %v589_v51, %v587_v50 }
 0x121   : > { %v558_v55 = vpop.f32.mrb[4].mxu0  ;;  %v604_v56 = vpack.c.bf16 %v590_v53, %v588_v52 }
 0x122   : > { %v559_v57 = vadd.f32 %v558_v55, %v347_v40  ;;  %v560_v58 = vpop.f32.mrb[5].mxu0 }
 0x123   : > { %v561_v59 = vadd.f32 %v560_v58, %v1796_v41  ;;  %v562_v60 = vpop.f32.mrb[6].mxu0  ;;  %847 = vmatprep.mubr.bf16.mxu1 %v604_v56 }
 0x124   : > { %v563_v61 = vadd.f32 %v562_v60, %v347_v40  ;;  %v564_v62 = vpop.f32.mrb[7].mxu0  ;;  %848 = vmatmul.mubr.bf16.vlgmr.msra.gmra.mrb[0].mxu1 %v603_v54  ;;  %v591_v0 = vmax.f32 %v559_v57, 0.0 }
 0x125   : > { %v565_v63 = vadd.f32 %v564_v62, %v1796_v41  ;;  %1334 = vmatpush3.bf16.msra.mxu1 %v1447_v25  ;;  %v592_v2 = vmax.f32 %v561_v59, 0.0 }
 0x126   : > { %v593_v1 = vmax.f32 %v563_v61, 0.0  ;;  %1327 = vmatprep.subr.bf16.mxu1 %v1448_v26 }
 0x127   : > { %v594_v3 = vmax.f32 %v565_v63, 0.0 }
 0x128   : > { %v605_v4 = vpack.c.bf16 %v593_v1, %v591_v0 }
 0x129   : > { %v606_v5 = vpack.c.bf16 %v594_v3, %v592_v2  ;;  %v568_v6 = vpop.f32.mrb[8].mxu0  ;;  %1335 = vmatpush3.bf16.msra.mxu1 %v1449_v27 }
 0x12a   : > { %v569_v7 = vadd.f32 %v568_v6, %v347_v40  ;;  %v570_v8 = vpop.f32.mrb[9].mxu0  ;;  %1328 = vmatprep.subr.bf16.mxu1 %v1450_v28 }
 0x12b   : > { %v571_v9 = vadd.f32 %v570_v8, %v1796_v41  ;;  %v572_v10 = vpop.f32.mrb[10].mxu0  ;;  %857 = vmatprep.mubr.bf16.mxu1 %v606_v5 }
 0x12c   : > { %v573_v11 = vadd.f32 %v572_v10, %v347_v40  ;;  %v574_v12 = vpop.f32.mrb[11].mxu0  ;;  %858 = vmatmul.mubr.bf16.gmra.mrb[4].mxu1 %v605_v4  ;;  %v595_v14 = vmax.f32 %v569_v7, 0.0 }
 0x12d   : > { %v575_v13 = vadd.f32 %v574_v12, %v1796_v41  ;;  %1336 = vmatpush3.bf16.msra.mxu1 %v1752_v29  ;;  %v596_v16 = vmax.f32 %v571_v9, 0.0 }
 0x12e   : > { %v597_v15 = vmax.f32 %v573_v11, 0.0  ;;  %1329 = vmatprep.subr.bf16.mxu1 %v1757_v30 }
 0x12f   : > { %v598_v17 = vmax.f32 %v575_v13, 0.0 }
 0x130   : > { %v607_v18 = vpack.c.bf16 %v597_v15, %v595_v14 }
 0x131   : > { %v608_v19 = vpack.c.bf16 %v598_v17, %v596_v16  ;;  %v578_v20 = vpop.f32.mrb[12].mxu0  ;;  %1337 = vmatpush3.bf16.msra.mxu1 %v1763_v31 }
 0x132   : > { %v579_v21 = vadd.f32 %v578_v20, %v347_v40  ;;  %v580_v22 = vpop.f32.mrb[13].mxu0  ;;  %1330 = vmatprep.subr.bf16.mxu1 %v1769_v32  ;;  %v1457_v32 = vld [vmem:[%s1859_s5 + $0x28] sm:$0xff]  }
 0x133   : > { %v581_v23 = vadd.f32 %v580_v22, %v1796_v41  ;;  %v582_v24 = vpop.f32.mrb[14].mxu0  ;;  %867 = vmatprep.mubr.bf16.mxu1 %v608_v19  ;;  %1297 = vmatpush3.bf16.msra.mxu0 %v1457_v32 }
 0x134   : > { %v583_v25 = vadd.f32 %v582_v24, %v347_v40  ;;  %v584_v26 = vpop.f32.mrb[15].mxu0  ;;  %868 = vmatmul.mubr.bf16.gmra.mrb[8].mxu1 %v607_v18  ;;  %v599_v28 = vmax.f32 %v579_v21, 0.0  ;;  %v1460_v40 = vld [vmem:[%s1859_s5 + $0x78] sm:$0xff]  }
 0x135   : > { %v585_v27 = vadd.f32 %v584_v26, %v1796_v41  ;;  %1338 = vmatpush3.bf16.msra.mxu1 %v1775_v33  ;;  %v600_v30 = vmax.f32 %v581_v23, 0.0  ;;  %v1458_v33 = vld [vmem:[%s1859_s5 + $0x70] sm:$0xff]   ;;  %v1461_v41 = vld [vmem:[%s1859_s5 + $0x38] sm:$0xff]  }
 0x136   : > { %v601_v29 = vmax.f32 %v583_v25, 0.0  ;;  %1331 = vmatprep.subr.bf16.mxu1 %v1781_v34  ;;  %v1459_v34 = vld [vmem:[%s1859_s5 + $0x30] sm:$0xff]   ;;  %1298 = vmatprep.subr.bf16.mxu0 %v1458_v33 }
 0x137   : > { %v602_v31 = vmax.f32 %v585_v27, 0.0  ;;  %1299 = vmatpush3.bf16.msra.mxu0 %v1459_v34 }
 0x138   : > { %v609_v35 = vpack.c.bf16 %v601_v29, %v599_v28  ;;  %1300 = vmatprep.subr.bf16.mxu0 %v1460_v40 }
 0x139   : > { %v610_v38 = vpack.c.bf16 %v602_v31, %v600_v30  ;;  %1339 = vmatpush3.bf16.msra.mxu1 %v1457_v32 }
 0x13a   : > { %1332 = vmatprep.subr.bf16.mxu1 %v1458_v33  ;;  %v1266_v33 = vld [vmem:[%s1860_s6] ss:$0 sm:$0xff] }
 0x13b   : > { %877 = vmatprep.mubr.bf16.mxu1 %v610_v38  ;;  %1301 = vmatpush3.bf16.msra.mxu0 %v1461_v41 }
 0x13c   : > { %878 = vmatmul.mubr.bf16.gmra.mrb[12].mxu1 %v609_v35 }
 0x13d   : > { %1340 = vmatpush3.bf16.msra.mxu1 %v1459_v34 }
 0x13e   : > { %1333 = vmatprep.subr.bf16.mxu1 %v1460_v40 }
 0x141   : > { %1341 = vmatpush3.bf16.msra.mxu1 %v1461_v41 }
 0x1f7   : > { %v849_v45 = vpop.f32.mrb[0].mxu1 }
 0x1f8   : > { %v850_v46 = vadd.f32 %v849_v45, %v648_v43  ;;  %v851_v47 = vpop.f32.mrb[1].mxu1 }
 0x1f9   : > { %v852_v48 = vadd.f32 %v851_v47, %v652_v44  ;;  %v853_v49 = vpop.f32.mrb[2].mxu1 }
 0x1fa   : > { %v854_v50 = vadd.f32 %v853_v49, %v648_v43  ;;  %v855_v51 = vpop.f32.mrb[3].mxu1  ;;  %v888_v53 = vmax.f32 %v850_v46, 0.0 }
 0x1fb   : > { %v856_v52 = vadd.f32 %v855_v51, %v652_v44  ;;  %v889_v55 = vmax.f32 %v852_v48, 0.0 }
 0x1fc   : > { %v890_v54 = vmax.f32 %v854_v50, 0.0 }
 0x1fd   : > { %v891_v56 = vmax.f32 %v856_v52, 0.0 }
 0x1fe   : > { %v904_v57 = vpack.c.bf16 %v890_v54, %v888_v53 }
 0x1ff   : > { %v905_v58 = vpack.c.bf16 %v891_v56, %v889_v55  ;;  %v859_v59 = vpop.f32.mrb[4].mxu1 }
 0x200   : > { %v860_v60 = vadd.f32 %v859_v59, %v648_v43  ;;  %v861_v37 = vpop.f32.mrb[5].mxu1 }
 0x201   : > { %v862_v61 = vadd.f32 %v861_v37, %v652_v44  ;;  %v863_v36 = vpop.f32.mrb[6].mxu1  ;;  %1079 = vmatprep.mubr.bf16.mxu0 %v905_v58 }
 0x202   : > { %v864_v39 = vadd.f32 %v863_v36, %v648_v43  ;;  %v865_v62 = vpop.f32.mrb[7].mxu1  ;;  %1080 = vmatmul.mubr.bf16.vlgmr.msra.gmra.mrb[16].mxu0 %v904_v57  ;;  %v892_v0 = vmax.f32 %v860_v60, 0.0 }
 0x203   : > { %v866_v63 = vadd.f32 %v865_v62, %v652_v44  ;;  %v893_v2 = vmax.f32 %v862_v61, 0.0 }
 0x204   : > { %v894_v1 = vmax.f32 %v864_v39, 0.0 }
 0x205   : > { %v895_v3 = vmax.f32 %v866_v63, 0.0 }
 0x206   : > { %v906_v4 = vpack.c.bf16 %v894_v1, %v892_v0 }
 0x207   : > { %v907_v5 = vpack.c.bf16 %v895_v3, %v893_v2  ;;  %v869_v6 = vpop.f32.mrb[8].mxu1 }
 0x208   : > { %v870_v7 = vadd.f32 %v869_v6, %v648_v43  ;;  %v871_v8 = vpop.f32.mrb[9].mxu1 }
 0x209   : > { %v872_v9 = vadd.f32 %v871_v8, %v652_v44  ;;  %v873_v10 = vpop.f32.mrb[10].mxu1  ;;  %1087 = vmatprep.mubr.bf16.mxu0 %v907_v5 }
 0x20a   : > { %v874_v11 = vadd.f32 %v873_v10, %v648_v43  ;;  %v875_v12 = vpop.f32.mrb[11].mxu1  ;;  %1088 = vmatmul.mubr.bf16.gmra.mrb[20].mxu0 %v906_v4  ;;  %v896_v14 = vmax.f32 %v870_v7, 0.0 }
 0x20b   : > { %v876_v13 = vadd.f32 %v875_v12, %v652_v44  ;;  %v897_v16 = vmax.f32 %v872_v9, 0.0 }
 0x20c   : > { %v898_v15 = vmax.f32 %v874_v11, 0.0 }
 0x20d   : > { %v899_v17 = vmax.f32 %v876_v13, 0.0 }
 0x20e   : > { %v908_v18 = vpack.c.bf16 %v898_v15, %v896_v14 }
 0x20f   : > { %v909_v19 = vpack.c.bf16 %v899_v17, %v897_v16  ;;  %v879_v20 = vpop.f32.mrb[12].mxu1 }
 0x210   : > { %v880_v21 = vadd.f32 %v879_v20, %v648_v43  ;;  %v881_v22 = vpop.f32.mrb[13].mxu1 }
 0x211   : > { %v882_v23 = vadd.f32 %v881_v22, %v652_v44  ;;  %v883_v24 = vpop.f32.mrb[14].mxu1  ;;  %1095 = vmatprep.mubr.bf16.mxu1 %v909_v19 }
 0x212   : > { %v884_v25 = vadd.f32 %v883_v24, %v648_v43  ;;  %v885_v26 = vpop.f32.mrb[15].mxu1  ;;  %1096 = vmatmul.mubr.bf16.vlgmr.msra.gmra.mrb[16].mxu1 %v908_v18  ;;  %v900_v28 = vmax.f32 %v880_v21, 0.0 }
 0x213   : > { %v886_v27 = vadd.f32 %v885_v26, %v652_v44  ;;  %v901_v30 = vmax.f32 %v882_v23, 0.0 }
 0x214   : > { %v902_v29 = vmax.f32 %v884_v25, 0.0 }
 0x215   : > { %v903_v31 = vmax.f32 %v886_v27, 0.0 }
 0x216   : > { %v910_v35 = vpack.c.bf16 %v902_v29, %v900_v28 }
 0x217   : > { %v911_v38 = vpack.c.bf16 %v903_v31, %v901_v30 }
 0x219   : > { %1103 = vmatprep.mubr.bf16.mxu1 %v911_v38 }
 0x21a   : > { %1104 = vmatmul.mubr.bf16.gmra.mrb[20].mxu1 %v910_v35 }
 0x2d5   : > { %v1302_v32 = vpop.f32.mrb[16].mxu0 }
 0x2d6   : > { %v1303_v34 = vpop.f32.mrb[17].mxu0 }
 0x2d7   : > { %v1304_v40 = vadd.f32 %v1303_v34, %v1302_v32  ;;  %v1305_v41 = vpop.f32.mrb[18].mxu0 }
 0x2d8   : > { %v1306_v42 = vpop.f32.mrb[19].mxu0 }
 0x2d9   : > { %v1082_v43 = vadd.f32 %v1304_v40, %v1266_v33  ;;  %v1307_v44 = vadd.f32 %v1306_v42, %v1305_v41 }
 0x2db   : > { %v1112_v45 = vmul.f32 %v1082_v43, %v1082_v43  ;;  %v1085_v46 = vadd.f32 %v1307_v44, %v1266_v33 }
 0x2dd   : > { %v1120_v47 = vadd.f32 1e-05, %v1112_v45  ;;  %v1113_v48 = vmul.f32 %v1085_v46, %v1085_v46  ;;  %v1308_v49 = vpop.f32.mrb[20].mxu0 }
 0x2de   : > { %v1309_v50 = vpop.f32.mrb[21].mxu0 }
 0x2df   : > { %1128 = vst [vmem:[%s1841_s12] sm:$0xff] %v1120_v47  ;;  %v1121_v51 = vadd.f32 1e-05, %v1113_v48  ;;  %v1310_v52 = vadd.f32 %v1309_v50, %v1308_v49  ;;  %v1311_v53 = vpop.f32.mrb[22].mxu0 }
 0x2e0   : > { %v1312_v54 = vpop.f32.mrb[23].mxu0 }
 0x2e1   : > { %1129 = vst [vmem:[%s1841_s12 + $0x8] sm:$0xff] %v1121_v51  ;;  %v1090_v55 = vadd.f32 %v1310_v52, %v1266_v33  ;;  %v1313_v56 = vadd.f32 %v1312_v54, %v1311_v53 }
 0x2e3   : > { %v1114_v57 = vmul.f32 %v1090_v55, %v1090_v55  ;;  %v1093_v58 = vadd.f32 %v1313_v56, %v1266_v33 }
 0x2e5   : > { %v1122_v59 = vadd.f32 1e-05, %v1114_v57  ;;  %v1115_v60 = vmul.f32 %v1093_v58, %v1093_v58  ;;  %v1314_v37 = vpop.f32.mrb[16].mxu1 }
 0x2e6   : > { %v1315_v61 = vpop.f32.mrb[17].mxu1 }
 0x2e7   : > { %1130 = vst [vmem:[%s1841_s12 + $0x10] sm:$0xff] %v1122_v59  ;;  %v1123_v36 = vadd.f32 1e-05, %v1115_v60  ;;  %v1316_v39 = vadd.f32 %v1315_v61, %v1314_v37  ;;  %v1317_v62 = vpop.f32.mrb[18].mxu1 }
 0x2e8   : > { %v1318_v63 = vpop.f32.mrb[19].mxu1 }
 0x2e9   : > { %1131 = vst [vmem:[%s1841_s12 + $0x18] sm:$0xff] %v1123_v36  ;;  %v1098_v0 = vadd.f32 %v1316_v39, %v1266_v33  ;;  %v1319_v1 = vadd.f32 %v1318_v63, %v1317_v62 }
 0x2eb   : > { %v1116_v2 = vmul.f32 %v1098_v0, %v1098_v0  ;;  %v1101_v3 = vadd.f32 %v1319_v1, %v1266_v33 }
 0x2ed   : > { %v1124_v4 = vadd.f32 1e-05, %v1116_v2  ;;  %v1117_v5 = vmul.f32 %v1101_v3, %v1101_v3  ;;  %v1320_v6 = vpop.f32.mrb[20].mxu1 }
 0x2ee   : > { %v1321_v7 = vpop.f32.mrb[21].mxu1 }
 0x2ef   : > { %1132 = vst [vmem:[%s1841_s12 + $0x20] sm:$0xff] %v1124_v4  ;;  %v1125_v8 = vadd.f32 1e-05, %v1117_v5  ;;  %v1322_v9 = vadd.f32 %v1321_v7, %v1320_v6  ;;  %v1323_v10 = vpop.f32.mrb[22].mxu1 }
 0x2f0   : > { %v1324_v11 = vpop.f32.mrb[23].mxu1 }
 0x2f1   : > { %1133 = vst [vmem:[%s1841_s12 + $0x28] sm:$0xff] %v1125_v8  ;;  %v1106_v12 = vadd.f32 %v1322_v9, %v1266_v33  ;;  %v1325_v13 = vadd.f32 %v1324_v11, %v1323_v10 }
 0x2f3   : > { %v1118_v14 = vmul.f32 %v1106_v12, %v1106_v12  ;;  %v1109_v15 = vadd.f32 %v1325_v13, %v1266_v33 }
 0x2f5   : > { %v1126_v16 = vadd.f32 1e-05, %v1118_v14  ;;  %v1119_v17 = vmul.f32 %v1109_v15, %v1109_v15 }
 0x2f7   : > { %1134 = vst [vmem:[%s1841_s12 + $0x30] sm:$0xff] %v1126_v16  ;;  %v1127_v18 = vadd.f32 1e-05, %v1119_v17 }
 0x2f9   : > { %1135 = vst [vmem:[%s1841_s12 + $0x38] sm:$0xff] %v1127_v18 }
 0x2fa PF: > { %s17_s24 = sadd.s32 1, %s1468_s24  }
 0x2fb   : > { %p14_p4 = scmp.ge.s32.totalorder %s17_s24, 4  }
 0x2fd   :  { %16 = sbr.rel (!%p14_p4) target bundleno = 1 (0x1), region = 78 }

</bundles_post_ra>
